<compile_context>
chip_gen: v5e
topology: v5e:2x2
jax: 0.10.0
libtpu: 0.0.40
codegen_flags: <defaults>
</compile_context>

<pallas_src>
import functools

import jax
import jax.numpy as jnp
from jax import lax
from jax.experimental import pallas as pl
from jax.experimental.pallas import tpu as pltpu


# ----------------------------------------------------------------------------
# Pallas kernel 1: tiled linear  out = X @ W + b   (bf16 MXU, f32 accumulate)
# ----------------------------------------------------------------------------
def _linear_kernel(x_ref, w_ref, b_ref, o_ref):
    acc = jnp.dot(x_ref[...], w_ref[...], preferred_element_type=jnp.float32)
    o_ref[...] = (acc + b_ref[...]).astype(o_ref.dtype)


def linear(x, w_t, b, *, tm=256, tn=512):
    """Tiled, pipelined X @ W_t + b on the MXU.

    x: (M, K), w_t: (K, N), b: (1, N) -> (M, N) f32.
    bf16 operands, f32 accumulation.  Grid is (col tiles, row tiles), both
    'parallel'; the weight/bias tiles are resident over the inner row sweep so
    the larger operand is only read from HBM once per column tile.  K is kept
    whole (K = latent_size/2 is small for this module).
    """
    m, k = x.shape
    _, n = w_t.shape
    x = x.astype(jnp.bfloat16)
    w_t = w_t.astype(jnp.bfloat16)
    b = b.astype(jnp.float32)

    # Capped tile sizes; cdiv grid handles non-dividing M/N via masked
    # partial tiles (safe here: K is whole, so padded rows/cols never leak
    # into valid outputs).  Keeps double-buffered VMEM use bounded.
    tm = m if m <= tm else tm          # multiple of 8 when tiled
    tn = n if n <= tn else tn          # multiple of 128 when tiled
    grid = (pl.cdiv(n, tn), pl.cdiv(m, tm))   # cols outer, rows inner

    return pl.pallas_call(
        _linear_kernel,
        out_shape=jax.ShapeDtypeStruct((m, n), jnp.float32),
        grid=grid,
        in_specs=[
            pl.BlockSpec((tm, k), lambda j, i: (i, 0)),   # activations stream
            pl.BlockSpec((k, tn), lambda j, i: (0, j)),   # weight tile resident
            pl.BlockSpec((1, tn), lambda j, i: (0, j)),   # bias tile resident
        ],
        out_specs=pl.BlockSpec((tm, tn), lambda j, i: (i, j)),
        compiler_params=pltpu.CompilerParams(
            dimension_semantics=("parallel", "parallel"),
            vmem_limit_bytes=32 * 1024 * 1024),
        cost_estimate=pl.CostEstimate(
            flops=2 * m * k * n,
            transcendentals=0,
            bytes_accessed=2 * (m * k + k * n) + 4 * (m * n + n)),
    )(x, w_t, b)


# ----------------------------------------------------------------------------
# Pallas kernel 2: LSTM recurrence, time-chunked, VMEM-carried h/c
# ----------------------------------------------------------------------------
def _lstm_chunk_kernel(gx_ref, whh_ref, z_ref, out_ref, hn_ref, cn_ref,
                       h_sc, c_sc, *, hidden, tc, bt):
    chunk = pl.program_id(1)

    @pl.when(chunk == 0)
    def _():
        # hidden = (z.unsqueeze(0), z.unsqueeze(0))  -> h0 = c0 = z
        h_sc[...] = z_ref[...]
        c_sc[...] = z_ref[...]

    whh = whh_ref[...]                                   # resident (H, 4H)

    # Full-vreg gate activations: one tanh pass + one sigmoid pass over the
    # whole (Bt, 4H) tile, blended per lane ([i|f|g|o] column order).
    lane = lax.broadcasted_iota(jnp.int32, (bt, 4 * hidden), 1)
    is_g = (lane >= 2 * hidden) & (lane < 3 * hidden)

    def step(t, carry):
        h_prev, c_prev = carry
        # gates_x already holds x_t @ W_ih^T + b_ih + b_hh (precomputed)
        gates = gx_ref[t] + jnp.dot(h_prev, whh,
                                    preferred_element_type=jnp.float32)
        tanh_all = jnp.tanh(gates)
        sig_all = 0.5 * jnp.tanh(0.5 * gates) + 0.5      # sigmoid, 1 EUP op
        act = jnp.where(is_g, tanh_all, sig_all)

        i_g = act[:, 0 * hidden:1 * hidden]
        f_g = act[:, 1 * hidden:2 * hidden]
        g_g = act[:, 2 * hidden:3 * hidden]
        o_g = act[:, 3 * hidden:4 * hidden]

        c_new = f_g * c_prev + i_g * g_g
        h_new = o_g * jnp.tanh(c_new)

        # Lane-dense per-step store: one (1, Bt*H) row (multiple of 128 lanes).
        out_ref[pl.ds(t, 1), :] = h_new.reshape(1, bt * hidden)
        return h_new, c_new

    h0 = h_sc[...]
    c0 = c_sc[...]
    h_last, c_last = lax.fori_loop(0, tc, step, (h0, c0), unroll=True)

    h_sc[...] = h_last
    c_sc[...] = c_last

    @pl.when(chunk == pl.num_programs(1) - 1)
    def _():
        hn_ref[0] = h_last
        cn_ref[0] = c_last


def lstm_recurrence(gates_x, w_hh_t, z, *, max_chunk=64):
    """gates_x: (T, B, 4H), w_hh_t: (H, 4H), z: (B, H) ->
    (out_h (T, B*H), h_n (1, B, H), c_n (1, B, H))."""
    t_len, batch, g = gates_x.shape
    hidden = g // 4

    # Time chunk: largest divisor of T that is <= max_chunk (T itself here).
    tc = 1
    for d in range(1, min(t_len, max_chunk) + 1):
        if t_len % d == 0:
            tc = d
    nc = t_len // tc

    # Batch tile: split across v7x's two TensorCores when B is large enough
    # and the resulting blocks stay (8,128)-legal and lane-dense.
    bt = batch
    if (batch >= 16 and (batch // 2) % 8 == 0
            and ((batch // 2) * hidden) % 128 == 0):
        bt = batch // 2
    nb = batch // bt

    kernel = functools.partial(_lstm_chunk_kernel, hidden=hidden, tc=tc, bt=bt)
    out_shape = (
        jax.ShapeDtypeStruct((t_len, batch * hidden), jnp.float32),
        jax.ShapeDtypeStruct((1, batch, hidden), jnp.float32),
        jax.ShapeDtypeStruct((1, batch, hidden), jnp.float32),
    )
    return pl.pallas_call(
        kernel,
        out_shape=out_shape,
        grid=(nb, nc),
        in_specs=[
            pl.BlockSpec((tc, bt, g), lambda b, c: (c, b, 0)),   # gates chunk
            pl.BlockSpec((hidden, g), lambda b, c: (0, 0)),      # W_hh^T resident
            pl.BlockSpec((bt, hidden), lambda b, c: (b, 0)),     # z (init state)
        ],
        out_specs=(
            pl.BlockSpec((tc, bt * hidden), lambda b, c: (c, b)),  # lane-dense out_h
            pl.BlockSpec((1, bt, hidden), lambda b, c: (0, b, 0)),  # h_n (resident)
            pl.BlockSpec((1, bt, hidden), lambda b, c: (0, b, 0)),  # c_n (resident)
        ),
        scratch_shapes=[
            pltpu.VMEM((bt, hidden), jnp.float32),   # h carry
            pltpu.VMEM((bt, hidden), jnp.float32),   # c carry
        ],
        compiler_params=pltpu.CompilerParams(
            dimension_semantics=("parallel", "arbitrary")),  # time is sequential
    )(gates_x, w_hh_t, z)


# ----------------------------------------------------------------------------
# Parameters (match the PyTorch module's init ranges)
# ----------------------------------------------------------------------------
def init_struct_decoder_params(key, vocab_size, latent_size, initrange=0.1):
    hidden = latent_size // 2
    k_emb, k_wih, k_whh, k_bih, k_bhh, k_proj = jax.random.split(key, 6)
    lstm_bound = 1.0 / (hidden ** 0.5)
    return {
        "embed_w": jax.random.uniform(
            k_emb, (vocab_size, hidden), jnp.float32, -initrange, initrange),
        # stored transposed for (row, lane-dense) matmuls
        "w_ih_t": jax.random.uniform(
            k_wih, (hidden, 4 * hidden), jnp.float32, -lstm_bound, lstm_bound),
        "w_hh_t": jax.random.uniform(
            k_whh, (hidden, 4 * hidden), jnp.float32, -lstm_bound, lstm_bound),
        # b_ih + b_hh folded into one bias applied once in the gate precompute
        "b_gates": (
            jax.random.uniform(k_bih, (1, 4 * hidden), jnp.float32,
                               -lstm_bound, lstm_bound)
            + jax.random.uniform(k_bhh, (1, 4 * hidden), jnp.float32,
                                 -lstm_bound, lstm_bound)),
        "w_proj_t": jax.random.uniform(
            k_proj, (hidden, vocab_size), jnp.float32, -initrange, initrange),
        "b_proj": jnp.zeros((1, vocab_size), jnp.float32),
    }


# ----------------------------------------------------------------------------
# StructDecoder.forward
# ----------------------------------------------------------------------------
def struct_decoder_forward(params, z, input_ids):
    """z: (B, H) f32, input_ids: (B, T) int32 -> (logits (T,B,V), (h_n, c_n))."""
    ids = input_ids.T                                   # input.permute(1, 0)
    t_len, batch = ids.shape
    hidden = z.shape[-1]

    # self.drop(self.embed(input)) -- dropout is identity in eval mode.
    emb = jnp.take(params["embed_w"], ids.reshape(-1), axis=0)   # (T*B, H)

    # Hoisted input-side gate matmul: one big lane-dense Pallas matmul.
    gates_x = linear(emb, params["w_ih_t"], params["b_gates"])   # (T*B, 4H)
    gates_x = gates_x.reshape(t_len, batch, 4 * hidden)

    # Sequential (time-chunked) LSTM recurrence with h0 = c0 = z.
    out_h, h_n, c_n = lstm_recurrence(gates_x, params["w_hh_t"], z)

    # self.drop(output) identity; proj over flattened (T*B, H) -> vocab.
    # out_h is (T, B*H); row-major reshape to (T*B, H) is a free view.
    logits = linear(out_h.reshape(t_len * batch, hidden),
                    params["w_proj_t"], params["b_proj"])        # (T*B, V)
    logits = logits.reshape(t_len, batch, -1)
    return logits, (h_n, c_n)


# ----------------------------------------------------------------------------
# Pure-JAX f32 reference (for correctness checking)
# ----------------------------------------------------------------------------
def _reference_forward(params, z, input_ids):
    ids = input_ids.T
    t_len, batch = ids.shape
    hidden = z.shape[-1]
    emb = jnp.take(params["embed_w"], ids.reshape(-1), axis=0)
    emb = emb.reshape(t_len, batch, hidden)

    def step(carry, x_t):
        h, c = carry
        gates = (x_t @ params["w_ih_t"] + params["b_gates"][0]
                 + h @ params["w_hh_t"])
        i_g = jax.nn.sigmoid(gates[:, :hidden])
        f_g = jax.nn.sigmoid(gates[:, hidden:2 * hidden])
        g_g = jnp.tanh(gates[:, 2 * hidden:3 * hidden])
        o_g = jax.nn.sigmoid(gates[:, 3 * hidden:])
        c = f_g * c + i_g * g_g
        h = o_g * jnp.tanh(c)
        return (h, c), h

    (h_n, c_n), outs = lax.scan(step, (z, z), emb)
    logits = outs.reshape(t_len * batch, hidden) @ params["w_proj_t"] \
        + params["b_proj"][0]
    return logits.reshape(t_len, batch, -1), (h_n[None], c_n[None])


if __name__ == "__main__":
    # Small shapes consistent with the module:
    #   latent_size=64 -> H = 32 (so 4H = 128, lane-dense gates),
    #   vocab=256 (lane-dense logits), batch=8, seq_len=8.
    vocab_size = 256
    latent_size = 64
    hidden = latent_size // 2
    batch = 8
    seq_len = 8

    key = jax.random.PRNGKey(0)
    k_param, k_z, k_ids = jax.random.split(key, 3)

    params = init_struct_decoder_params(k_param, vocab_size, latent_size)
    z = jax.random.normal(k_z, (batch, hidden), jnp.float32)
    input_ids = jax.random.randint(
        k_ids, (batch, seq_len), 0, vocab_size, jnp.int32)

    logits, (h_n, c_n) = struct_decoder_forward(params, z, input_ids)
    jax.block_until_ready((logits, h_n, c_n))

    assert logits.shape == (seq_len, batch, vocab_size)
    assert h_n.shape == (1, batch, hidden)
    assert c_n.shape == (1, batch, hidden)
    assert bool(jnp.all(jnp.isfinite(logits)))

    # f32 reference; tolerances loosened because the two big linears feed the
    # MXU in bf16 (f32 accumulation).
    ref_logits, (ref_h, ref_c) = _reference_forward(params, z, input_ids)
    assert jnp.allclose(logits, ref_logits, atol=5e-2, rtol=5e-2)
    assert jnp.allclose(h_n, ref_h, atol=2e-2, rtol=2e-2)
    assert jnp.allclose(c_n, ref_c, atol=2e-2, rtol=2e-2)

    print("KERNEL_OK")
</pallas_src>

<mosaic_0001>
module attributes {stable_mosaic.version = 11 : i64} {
  func.func @_linear_kernel(%arg0: i32, %arg1: i32, %arg2: memref<64x32xbf16, #tpu.memory_space<vmem>>, %arg3: memref<32x128xbf16, #tpu.memory_space<vmem>>, %arg4: memref<1x128xf32, #tpu.memory_space<vmem>>, %arg5: memref<64x128xf32, #tpu.memory_space<vmem>>) attributes {dimension_semantics = [#tpu.dimension_semantics<parallel>, #tpu.dimension_semantics<parallel>], iteration_bounds = array<i64: 1, 1>, scalar_prefetch = 0 : i64, scratch_operands = 0 : i64, tpu.core_type = #tpu.core_type<tc>, window_params = [{transform_indices = @transform_0, window_bounds = array<i64: 64, 32>}, {transform_indices = @transform_1, window_bounds = array<i64: 32, 128>}, {transform_indices = @transform_2, window_bounds = array<i64: 1, 128>}, {transform_indices = @transform_3, window_bounds = array<i64: 64, 128>}]} {
    %c0 = arith.constant 0 : index
    %c0_0 = arith.constant 0 : index
    %0 = vector.load %arg2[%c0, %c0_0] : memref<64x32xbf16, #tpu.memory_space<vmem>>, vector<64x32xbf16>
    %c0_1 = arith.constant 0 : index
    %c0_2 = arith.constant 0 : index
    %1 = vector.load %arg3[%c0_1, %c0_2] : memref<32x128xbf16, #tpu.memory_space<vmem>>, vector<32x128xbf16>
    %cst = arith.constant dense<0.000000e+00> : vector<64x128xf32>
    %2 = tpu.matmul %0, %1, %cst {dimension_numbers = #tpu.dot_dimension_numbers<[1], [0], [0], [1], [0, 0, 1, 1], [], []>} : vector<64x32xbf16>, vector<32x128xbf16>, vector<64x128xf32> -> vector<64x128xf32>
    %c0_3 = arith.constant 0 : index
    %c0_4 = arith.constant 0 : index
    %3 = vector.load %arg4[%c0_3, %c0_4] : memref<1x128xf32, #tpu.memory_space<vmem>>, vector<1x128xf32>
    %4 = vector.broadcast %3 : vector<1x128xf32> to vector<64x128xf32>
    %5 = arith.addf %2, %4 : vector<64x128xf32>
    %c0_5 = arith.constant 0 : index
    %c0_6 = arith.constant 0 : index
    %6 = vector.load %arg5[%c0_5, %c0_6] : memref<64x128xf32, #tpu.memory_space<vmem>>, vector<64x128xf32>
    tpu.vector_store %arg5[%c0_5, %c0_6], %5 {strides = array<i32>} : memref<64x128xf32, #tpu.memory_space<vmem>>, vector<64x128xf32>,
    return
  }
  func.func @transform_0(%arg0: i32, %arg1: i32) -> (i32, i32) {
    %c0_i32 = arith.constant 0 : i32
    %c0_i32_0 = arith.constant 0 : i32
    return %arg1, %c0_i32 : i32, i32
  }
  func.func @transform_1(%arg0: i32, %arg1: i32) -> (i32, i32) {
    %c0_i32 = arith.constant 0 : i32
    %c0_i32_0 = arith.constant 0 : i32
    return %c0_i32, %arg0 : i32, i32
  }
  func.func @transform_2(%arg0: i32, %arg1: i32) -> (i32, i32) {
    %c0_i32 = arith.constant 0 : i32
    %c0_i32_0 = arith.constant 0 : i32
    return %c0_i32, %arg0 : i32, i32
  }
  func.func @transform_3(%arg0: i32, %arg1: i32) -> (i32, i32) {
    %c0_i32 = arith.constant 0 : i32
    return %arg1, %arg0 : i32, i32
  }
}

</mosaic_0001>

<bundles_post_ra>
// kernel: tpu_custom_call.1
= control target key start
LH: loop header
LB: loop body
LE: loop exit
PB: predicated region body
PF: predicated region fallthrough
CT: control target
= control target key end

     0   :  { %s249_s0 = inlined_call_operand.vmem [shape: bf16[64,32], index: 0, kind: input, shape index: {}]   ;;  %s250_s1 = inlined_call_operand.vmem [shape: bf16[32,128], index: 1, kind: input, shape index: {}]   ;;  %s251_s2 = inlined_call_operand.vmem [shape: f32[1,128], index: 2, kind: input, shape index: {}]   ;;  %s252_s3 = inlined_call_operand.hbm [shape: f32[64,128], index: 3, kind: output, shape index: {}]  }
   0x1   :  { %v165_v0 = vld [vmem:[%s250_s1 + $0x8] sm:$0xff]  ;;  %v164_v1 = vld [vmem:[%s250_s1] sm:$0xff] }
   0x2   :  { %83 = vmatpush.bf16.msra.mxu0 %v165_v0  ;;  %166 = vmatpush.bf16.msra.mxu1 %v165_v0 }
   0x3   :  { %8 = vsyncpa [#allocation3], 0  ;;  %167 = vmatpush.bf16.msra.mxu2 %v165_v0  ;;  %168 = vmatpush.bf16.msra.mxu3 %v165_v0  ;;  %v160_v2 = vld [vmem:[%s249_s0] sm:$0xff]  ;;  %v161_v3 = vld [vmem:[%s249_s0 + $0x8] sm:$0xff]  ;;  %vm64_vm0 = vcmask 261120   ;;  %s120_s27 = sshll.u32 %s252_s3, 4  ;;  %s121_s27 = int_to_ptr.hbm [resolvable:$true] %s120_s27 }
   0x4   :  { %v162_v4 = vld [vmem:[%s249_s0 + $0x10] sm:$0xff]  ;;  %v163_v5 = vld [vmem:[%s249_s0 + $0x18] sm:$0xff]  ;;  %v175_v6 = vld [vmem:[%s251_s2] ss:$0 sm:$0xff]  ;;  %s202_s0 = smov [#allocation2]   ;;  %s203_s28 = smov 128  }
   0x5   :  { %s118_s2 = sshll.u32 %s202_s0, 4  ;;  %s204_s29 = smov 8   ;;  %s119_s2 = int_to_ptr.vmem [resolvable:$true] %s118_s2 }
   0x6   :  { %84 = vmatpush.bf16.msra.mxu0 %v164_v1  ;;  %169 = vmatpush.bf16.msra.mxu1 %v164_v1 }
   0x7   :  { %170 = vmatpush.bf16.msra.mxu2 %v164_v1  ;;  %171 = vmatpush.bf16.msra.mxu3 %v164_v1 }
   0x9   :  { %156 = vmatmul.msk.bf16.vlgmr.msra.gmra.mxu0 %vm64_vm0, %v160_v2  ;;  %157 = vmatmul.msk.bf16.vlgmr.msra.gmra.mxu1 %vm64_vm0, %v161_v3 }
   0xa   :  { %158 = vmatmul.msk.bf16.vlgmr.msra.gmra.mxu2 %vm64_vm0, %v162_v4  ;;  %159 = vmatmul.msk.bf16.vlgmr.msra.gmra.mxu3 %vm64_vm0, %v163_v5 }
  0x86   :  { %v86_v7 = vpop.f32.mrf.mxu0  ;;  %v91_v8 = vpop.f32.mrf.mxu1 }
  0x87   :  { %v87_v9 = vadd.f32 %v175_v6, %v86_v7  ;;  %v92_v10 = vadd.f32 %v175_v6, %v91_v8 }
  0x89   :  { %106 = vst [vmem:[#allocation2] sm:$0xff] %v87_v9 }
  0x8a   :  { %108 = vst [vmem:[#allocation2 + $0x10] sm:$0xff] %v92_v10 }
  0x8d   :  { %v96_v11 = vpop.f32.mrf.mxu2  ;;  %v101_v12 = vpop.f32.mrf.mxu3 }
  0x8e   :  { %v97_v13 = vadd.f32 %v175_v6, %v96_v11  ;;  %v102_v14 = vadd.f32 %v175_v6, %v101_v12  ;;  %v88_v15 = vpop.f32.mrf.mxu0  ;;  %v93_v16 = vpop.f32.mrf.mxu1 }
  0x8f   :  { %v89_v17 = vadd.f32 %v175_v6, %v88_v15  ;;  %v94_v18 = vadd.f32 %v175_v6, %v93_v16 }
  0x90   :  { %110 = vst [vmem:[#allocation2 + $0x20] sm:$0xff] %v97_v13 }
  0x91   :  { %112 = vst [vmem:[#allocation2 + $0x30] sm:$0xff] %v102_v14 }
  0x92   :  { %107 = vst [vmem:[#allocation2 + $0x8] sm:$0xff] %v89_v17 }
  0x93   :  { %109 = vst [vmem:[#allocation2 + $0x18] sm:$0xff] %v94_v18 }
  0x95   :  { %v98_v19 = vpop.f32.mrf.mxu2  ;;  %v103_v20 = vpop.f32.mrf.mxu3 }
  0x96   :  { %v99_v21 = vadd.f32 %v175_v6, %v98_v19  ;;  %v104_v22 = vadd.f32 %v175_v6, %v103_v20 }
  0x98   :  { %111 = vst [vmem:[#allocation2 + $0x28] sm:$0xff] %v99_v21 }
  0x99   :  { %113 = vst [vmem:[#allocation2 + $0x38] sm:$0xff] %v104_v22 }
  0x9a   :  { %126 = dma.vmem_to_hbm [thread:$0]  %s119_s2, 1024, %s121_s27, [#allocation3], %s203_s28, %s203_s28, %s204_s29  }
  0x9b   :  { %200 = dma.done.wait [#allocation3], 1024  }
  0x9c   :  { %201 = vsyncadd [#allocation3], 4294966272 }
  0x9d   :  { %131 = vsyncpa [#allocation3], 1 }

</bundles_post_ra>
